<compile_context>
chip_gen: v6e
topology: v6e:2x2x1
jax: 0.10.0
libtpu: 0.0.40
codegen_flags: <defaults>
</compile_context>

<pallas_src>
import jax
import jax.numpy as jnp
from jax.experimental import pallas as pl
from jax.experimental.pallas import tpu as pltpu

N_INPUT = 784
N_PAD = 896        # 7 * 128: lane-aligned contraction dim for layer 1
HIDDEN = 128       # non-cuda hidden size in the reference module
HEAD_PAD = 128     # lane-dense output head (real head is 1 column)
TB_MAX = 512       # batch tile; 2 x TB x 896 x 2B (bf16) stays ~1.8 MiB


def _round_up(x, m):
    return (x + m - 1) // m * m


def _leaky_relu(x, alpha=0.2):
    return jnp.where(x > 0, x, alpha * x)


def discriminator_kernel(x_ref,
                         w1_ref, b1_ref,
                         w2_ref, b2_ref,
                         w3_ref, b3_ref,
                         w4_ref, b4_ref,
                         o_ref):
    # All matmuls: bf16 operands, f32 accumulation on the MXU.
    # Activation / bias math stays in f32 (v5e has no bf16 VPU/EUP path).
    h = jnp.dot(x_ref[...], w1_ref[...], preferred_element_type=jnp.float32)
    h = _leaky_relu(h + b1_ref[...])

    h = jnp.dot(h.astype(jnp.bfloat16), w2_ref[...],
                preferred_element_type=jnp.float32)
    h = _leaky_relu(h + b2_ref[...])

    h = jnp.dot(h.astype(jnp.bfloat16), w3_ref[...],
                preferred_element_type=jnp.float32)
    h = _leaky_relu(h + b3_ref[...])

    logits = jnp.dot(h.astype(jnp.bfloat16), w4_ref[...],
                     preferred_element_type=jnp.float32)
    logits = logits + b4_ref[...]

    # Sigmoid: exp on the EUP; exact reciprocal keeps full f32 fidelity.
    e = jnp.exp(-logits)
    o_ref[...] = pl.reciprocal(1.0 + e, approx=False)


def discriminator_forward(x, params):
    """x: [B, 1, 28, 28] or [B, 784] float32.  Returns [B, 1] float32."""
    x2d = x.reshape(-1, N_INPUT).astype(jnp.float32)
    B = x2d.shape[0]
    w1, b1, w2, b2, w3, b3, w4, b4 = params

    # Batch tiling; ragged batches are zero-padded to a multiple of TB.
    TB = min(TB_MAX, _round_up(B, 8))
    B_pad = _round_up(B, TB)

    # Lane-aligned / bf16 operands (zero padding => mathematically identical).
    x_p = jnp.zeros((B_pad, N_PAD), jnp.bfloat16).at[:B, :N_INPUT].set(
        x2d.astype(jnp.bfloat16))
    w1_p = jnp.zeros((N_PAD, HIDDEN), jnp.bfloat16).at[:N_INPUT, :].set(
        w1.astype(jnp.bfloat16))
    w2_b = w2.astype(jnp.bfloat16)
    w3_b = w3.astype(jnp.bfloat16)
    w4_p = jnp.zeros((HIDDEN, HEAD_PAD), jnp.bfloat16).at[:, :1].set(
        w4.astype(jnp.bfloat16))
    b4_p = jnp.zeros((1, HEAD_PAD), jnp.float32).at[:, :1].set(
        b4.astype(jnp.float32))

    grid = (B_pad // TB,)
    const = lambda shape: pl.BlockSpec(shape, lambda i: (0, 0))
    in_specs = [
        pl.BlockSpec((TB, N_PAD), lambda i: (i, 0)),   # x: tiled over batch
        const((N_PAD, HIDDEN)), const((1, HIDDEN)),    # layer 1 (resident)
        const((HIDDEN, HIDDEN)), const((1, HIDDEN)),   # layer 2 (resident)
        const((HIDDEN, HIDDEN)), const((1, HIDDEN)),   # layer 3 (resident)
        const((HIDDEN, HEAD_PAD)), const((1, HEAD_PAD)),  # head (resident)
    ]
    out_spec = pl.BlockSpec((TB, HEAD_PAD), lambda i: (i, 0))

    out = pl.pallas_call(
        discriminator_kernel,
        out_shape=jax.ShapeDtypeStruct((B_pad, HEAD_PAD), jnp.float32),
        grid=grid,
        in_specs=in_specs,
        out_specs=out_spec,
        compiler_params=pltpu.CompilerParams(
            dimension_semantics=("parallel",),     # shard batch over v7x TCs
            vmem_limit_bytes=32 << 20,             # legal on v7x's 64 MiB VMEM
        ),
    )(x_p, w1_p, b1, w2_b, b2, w3_b, b3, w4_p, b4_p)

    return out[:B, :1]


def init_params(key):
    """Deterministic init mimicking nn.Linear default (U[-1/sqrt(fan_in), +])."""
    def linear(k, fan_in, fan_out):
        kw, kb = jax.random.split(k)
        bound = 1.0 / jnp.sqrt(fan_in)
        w = jax.random.uniform(kw, (fan_in, fan_out), jnp.float32, -bound, bound)
        b = jax.random.uniform(kb, (1, fan_out), jnp.float32, -bound, bound)
        return w, b

    k1, k2, k3, k4 = jax.random.split(key, 4)
    w1, b1 = linear(k1, N_INPUT, HIDDEN)
    w2, b2 = linear(k2, HIDDEN, HIDDEN)
    w3, b3 = linear(k3, HIDDEN, HIDDEN)
    w4, b4 = linear(k4, HIDDEN, 1)
    return (w1, b1, w2, b2, w3, b3, w4, b4)


def _reference(x, params):
    """Plain-JAX reference with identical bf16-operand / f32-accum math."""
    w1, b1, w2, b2, w3, b3, w4, b4 = params

    def bdot(a, w):
        return jnp.dot(a.astype(jnp.bfloat16), w.astype(jnp.bfloat16),
                       preferred_element_type=jnp.float32)

    h = x.reshape(-1, N_INPUT).astype(jnp.float32)
    h = jax.nn.leaky_relu(bdot(h, w1) + b1, 0.2)
    h = jax.nn.leaky_relu(bdot(h, w2) + b2, 0.2)
    h = jax.nn.leaky_relu(bdot(h, w3) + b3, 0.2)
    return jax.nn.sigmoid(bdot(h, w4) + b4)


if __name__ == "__main__":
    key = jax.random.PRNGKey(0)
    kx, kx2, kp = jax.random.split(key, 3)
    params = init_params(kp)

    # Small MNIST-like NCHW input: [8, 1, 28, 28]; forward flattens to [B, 784].
    x_small = jax.random.normal(kx, (8, 1, 28, 28), dtype=jnp.float32)
    out_small = jax.block_until_ready(discriminator_forward(x_small, params))
    exp_small = _reference(x_small, params)
    assert out_small.shape == (8, 1), out_small.shape
    assert jnp.allclose(out_small, exp_small, atol=1e-3, rtol=1e-3), (
        float(jnp.max(jnp.abs(out_small - exp_small))))

    # Ragged larger batch to exercise the multi-step batch grid (TB=512, grid=2).
    x_big = jax.random.normal(kx2, (600, 1, 28, 28), dtype=jnp.float32)
    out_big = jax.block_until_ready(discriminator_forward(x_big, params))
    exp_big = _reference(x_big, params)
    assert out_big.shape == (600, 1), out_big.shape
    assert jnp.allclose(out_big, exp_big, atol=1e-3, rtol=1e-3), (
        float(jnp.max(jnp.abs(out_big - exp_big))))

    print("KERNEL_OK")
</pallas_src>

<mosaic_0001>
module attributes {stable_mosaic.version = 11 : i64} {
  func.func @discriminator_kernel(%arg0: i32, %arg1: memref<8x896xbf16, #tpu.memory_space<vmem>>, %arg2: memref<896x128xbf16, #tpu.memory_space<vmem>>, %arg3: memref<1x128xf32, #tpu.memory_space<vmem>>, %arg4: memref<128x128xbf16, #tpu.memory_space<vmem>>, %arg5: memref<1x128xf32, #tpu.memory_space<vmem>>, %arg6: memref<128x128xbf16, #tpu.memory_space<vmem>>, %arg7: memref<1x128xf32, #tpu.memory_space<vmem>>, %arg8: memref<128x128xbf16, #tpu.memory_space<vmem>>, %arg9: memref<1x128xf32, #tpu.memory_space<vmem>>, %arg10: memref<8x128xf32, #tpu.memory_space<vmem>>) attributes {dimension_semantics = [#tpu.dimension_semantics<parallel>], iteration_bounds = array<i64: 1>, scalar_prefetch = 0 : i64, scratch_operands = 0 : i64, tpu.core_type = #tpu.core_type<tc>, window_params = [{transform_indices = @transform_0, window_bounds = array<i64: 8, 896>}, {pipeline_mode = #tpu.pipeline_mode<synchronous>, transform_indices = @transform_1, window_bounds = array<i64: 896, 128>}, {pipeline_mode = #tpu.pipeline_mode<synchronous>, transform_indices = @transform_2, window_bounds = array<i64: 1, 128>}, {pipeline_mode = #tpu.pipeline_mode<synchronous>, transform_indices = @transform_3, window_bounds = array<i64: 128, 128>}, {pipeline_mode = #tpu.pipeline_mode<synchronous>, transform_indices = @transform_4, window_bounds = array<i64: 1, 128>}, {pipeline_mode = #tpu.pipeline_mode<synchronous>, transform_indices = @transform_5, window_bounds = array<i64: 128, 128>}, {pipeline_mode = #tpu.pipeline_mode<synchronous>, transform_indices = @transform_6, window_bounds = array<i64: 1, 128>}, {pipeline_mode = #tpu.pipeline_mode<synchronous>, transform_indices = @transform_7, window_bounds = array<i64: 128, 128>}, {pipeline_mode = #tpu.pipeline_mode<synchronous>, transform_indices = @transform_8, window_bounds = array<i64: 1, 128>}, {transform_indices = @transform_9, window_bounds = array<i64: 8, 128>}]} {
    %c0 = arith.constant 0 : index
    %c0_0 = arith.constant 0 : index
    %0 = vector.load %arg1[%c0, %c0_0] : memref<8x896xbf16, #tpu.memory_space<vmem>>, vector<8x896xbf16>
    %c0_1 = arith.constant 0 : index
    %c0_2 = arith.constant 0 : index
    %1 = vector.load %arg2[%c0_1, %c0_2] : memref<896x128xbf16, #tpu.memory_space<vmem>>, vector<896x128xbf16>
    %cst = arith.constant dense<0.000000e+00> : vector<8x128xf32>
    %2 = tpu.matmul %0, %1, %cst {dimension_numbers = #tpu.dot_dimension_numbers<[1], [0], [0], [1], [0, 0, 1, 1], [], []>} : vector<8x896xbf16>, vector<896x128xbf16>, vector<8x128xf32> -> vector<8x128xf32>
    %c0_3 = arith.constant 0 : index
    %c0_4 = arith.constant 0 : index
    %3 = vector.load %arg3[%c0_3, %c0_4] : memref<1x128xf32, #tpu.memory_space<vmem>>, vector<1x128xf32>
    %4 = vector.broadcast %3 : vector<1x128xf32> to vector<8x128xf32>
    %5 = arith.addf %2, %4 : vector<8x128xf32>
    %cst_5 = arith.constant 0.000000e+00 : f32
    %6 = vector.broadcast %cst_5 : f32 to vector<8x128xf32>
    %7 = arith.cmpf ogt, %5, %6 : vector<8x128xf32>
    %cst_6 = arith.constant 2.000000e-01 : f32
    %8 = vector.broadcast %cst_6 : f32 to vector<8x128xf32>
    %9 = arith.mulf %8, %5 : vector<8x128xf32>
    %10 = arith.select %7, %5, %9 : vector<8x128xi1>, vector<8x128xf32>
    %11 = arith.truncf %10 : vector<8x128xf32> to vector<8x128xbf16>
    %c0_7 = arith.constant 0 : index
    %c0_8 = arith.constant 0 : index
    %12 = vector.load %arg4[%c0_7, %c0_8] : memref<128x128xbf16, #tpu.memory_space<vmem>>, vector<128x128xbf16>
    %cst_9 = arith.constant dense<0.000000e+00> : vector<8x128xf32>
    %13 = tpu.matmul %11, %12, %cst_9 {dimension_numbers = #tpu.dot_dimension_numbers<[1], [0], [0], [1], [0, 0, 1, 1], [], []>} : vector<8x128xbf16>, vector<128x128xbf16>, vector<8x128xf32> -> vector<8x128xf32>
    %c0_10 = arith.constant 0 : index
    %c0_11 = arith.constant 0 : index
    %14 = vector.load %arg5[%c0_10, %c0_11] : memref<1x128xf32, #tpu.memory_space<vmem>>, vector<1x128xf32>
    %15 = vector.broadcast %14 : vector<1x128xf32> to vector<8x128xf32>
    %16 = arith.addf %13, %15 : vector<8x128xf32>
    %cst_12 = arith.constant 0.000000e+00 : f32
    %17 = vector.broadcast %cst_12 : f32 to vector<8x128xf32>
    %18 = arith.cmpf ogt, %16, %17 : vector<8x128xf32>
    %cst_13 = arith.constant 2.000000e-01 : f32
    %19 = vector.broadcast %cst_13 : f32 to vector<8x128xf32>
    %20 = arith.mulf %19, %16 : vector<8x128xf32>
    %21 = arith.select %18, %16, %20 : vector<8x128xi1>, vector<8x128xf32>
    %22 = arith.truncf %21 : vector<8x128xf32> to vector<8x128xbf16>
    %c0_14 = arith.constant 0 : index
    %c0_15 = arith.constant 0 : index
    %23 = vector.load %arg6[%c0_14, %c0_15] : memref<128x128xbf16, #tpu.memory_space<vmem>>, vector<128x128xbf16>
    %cst_16 = arith.constant dense<0.000000e+00> : vector<8x128xf32>
    %24 = tpu.matmul %22, %23, %cst_16 {dimension_numbers = #tpu.dot_dimension_numbers<[1], [0], [0], [1], [0, 0, 1, 1], [], []>} : vector<8x128xbf16>, vector<128x128xbf16>, vector<8x128xf32> -> vector<8x128xf32>
    %c0_17 = arith.constant 0 : index
    %c0_18 = arith.constant 0 : index
    %25 = vector.load %arg7[%c0_17, %c0_18] : memref<1x128xf32, #tpu.memory_space<vmem>>, vector<1x128xf32>
    %26 = vector.broadcast %25 : vector<1x128xf32> to vector<8x128xf32>
    %27 = arith.addf %24, %26 : vector<8x128xf32>
    %cst_19 = arith.constant 0.000000e+00 : f32
    %28 = vector.broadcast %cst_19 : f32 to vector<8x128xf32>
    %29 = arith.cmpf ogt, %27, %28 : vector<8x128xf32>
    %cst_20 = arith.constant 2.000000e-01 : f32
    %30 = vector.broadcast %cst_20 : f32 to vector<8x128xf32>
    %31 = arith.mulf %30, %27 : vector<8x128xf32>
    %32 = arith.select %29, %27, %31 : vector<8x128xi1>, vector<8x128xf32>
    %33 = arith.truncf %32 : vector<8x128xf32> to vector<8x128xbf16>
    %c0_21 = arith.constant 0 : index
    %c0_22 = arith.constant 0 : index
    %34 = vector.load %arg8[%c0_21, %c0_22] : memref<128x128xbf16, #tpu.memory_space<vmem>>, vector<128x128xbf16>
    %cst_23 = arith.constant dense<0.000000e+00> : vector<8x128xf32>
    %35 = tpu.matmul %33, %34, %cst_23 {dimension_numbers = #tpu.dot_dimension_numbers<[1], [0], [0], [1], [0, 0, 1, 1], [], []>} : vector<8x128xbf16>, vector<128x128xbf16>, vector<8x128xf32> -> vector<8x128xf32>
    %c0_24 = arith.constant 0 : index
    %c0_25 = arith.constant 0 : index
    %36 = vector.load %arg9[%c0_24, %c0_25] : memref<1x128xf32, #tpu.memory_space<vmem>>, vector<1x128xf32>
    %37 = vector.broadcast %36 : vector<1x128xf32> to vector<8x128xf32>
    %38 = arith.addf %35, %37 : vector<8x128xf32>
    %cst_26 = arith.constant 0.000000e+00 : f32
    %39 = vector.broadcast %cst_26 : f32 to vector<8x128xf32>
    %40 = arith.subf %39, %38 : vector<8x128xf32>
    %41 = math.exp %40 : vector<8x128xf32>
    %cst_27 = arith.constant 1.000000e+00 : f32
    %42 = vector.broadcast %cst_27 : f32 to vector<8x128xf32>
    %43 = arith.addf %42, %41 : vector<8x128xf32>
    %44 = tpu.reciprocal %43 : vector<8x128xf32> -> vector<8x128xf32>
    %c0_28 = arith.constant 0 : index
    %c0_29 = arith.constant 0 : index
    %45 = vector.load %arg10[%c0_28, %c0_29] : memref<8x128xf32, #tpu.memory_space<vmem>>, vector<8x128xf32>
    tpu.vector_store %arg10[%c0_28, %c0_29], %44 {strides = array<i32>} : memref<8x128xf32, #tpu.memory_space<vmem>>, vector<8x128xf32>,
    return
  }
  func.func @transform_0(%arg0: i32) -> (i32, i32) {
    %c0_i32 = arith.constant 0 : i32
    %c0_i32_0 = arith.constant 0 : i32
    return %arg0, %c0_i32 : i32, i32
  }
  func.func @transform_1(%arg0: i32) -> (i32, i32) {
    %c0_i32 = arith.constant 0 : i32
    %c0_i32_0 = arith.constant 0 : i32
    %c0_i32_1 = arith.constant 0 : i32
    return %c0_i32, %c0_i32_0 : i32, i32
  }
  func.func @transform_2(%arg0: i32) -> (i32, i32) {
    %c0_i32 = arith.constant 0 : i32
    %c0_i32_0 = arith.constant 0 : i32
    %c0_i32_1 = arith.constant 0 : i32
    return %c0_i32, %c0_i32_0 : i32, i32
  }
  func.func @transform_3(%arg0: i32) -> (i32, i32) {
    %c0_i32 = arith.constant 0 : i32
    %c0_i32_0 = arith.constant 0 : i32
    %c0_i32_1 = arith.constant 0 : i32
    return %c0_i32, %c0_i32_0 : i32, i32
  }
  func.func @transform_4(%arg0: i32) -> (i32, i32) {
    %c0_i32 = arith.constant 0 : i32
    %c0_i32_0 = arith.constant 0 : i32
    %c0_i32_1 = arith.constant 0 : i32
    return %c0_i32, %c0_i32_0 : i32, i32
  }
  func.func @transform_5(%arg0: i32) -> (i32, i32) {
    %c0_i32 = arith.constant 0 : i32
    %c0_i32_0 = arith.constant 0 : i32
    %c0_i32_1 = arith.constant 0 : i32
    return %c0_i32, %c0_i32_0 : i32, i32
  }
  func.func @transform_6(%arg0: i32) -> (i32, i32) {
    %c0_i32 = arith.constant 0 : i32
    %c0_i32_0 = arith.constant 0 : i32
    %c0_i32_1 = arith.constant 0 : i32
    return %c0_i32, %c0_i32_0 : i32, i32
  }
  func.func @transform_7(%arg0: i32) -> (i32, i32) {
    %c0_i32 = arith.constant 0 : i32
    %c0_i32_0 = arith.constant 0 : i32
    %c0_i32_1 = arith.constant 0 : i32
    return %c0_i32, %c0_i32_0 : i32, i32
  }
  func.func @transform_8(%arg0: i32) -> (i32, i32) {
    %c0_i32 = arith.constant 0 : i32
    %c0_i32_0 = arith.constant 0 : i32
    %c0_i32_1 = arith.constant 0 : i32
    return %c0_i32, %c0_i32_0 : i32, i32
  }
  func.func @transform_9(%arg0: i32) -> (i32, i32) {
    %c0_i32 = arith.constant 0 : i32
    %c0_i32_0 = arith.constant 0 : i32
    return %arg0, %c0_i32 : i32, i32
  }
}

</mosaic_0001>

<bundles_post_ra>
// kernel: tpu_custom_call.1
= control target key start
LH: loop header
LB: loop body
LE: loop exit
PB: predicated region body
PF: predicated region fallthrough
CT: control target
= control target key end

     0   :  { %14 = vsyncpa [#allocation3], 0  ;;  %s1756_s0 = inlined_call_operand.hbm [shape: bf16[8,896], index: 0, kind: input, shape index: {}]   ;;  %s1757_s1 = inlined_call_operand.hbm [shape: bf16[896,128], index: 1, kind: input, shape index: {}]   ;;  %s1758_s2 = inlined_call_operand.vmem [shape: f32[1,128], index: 2, kind: input, shape index: {}]   ;;  %s1759_s3 = inlined_call_operand.hbm [shape: bf16[128,128], index: 3, kind: input, shape index: {}]   ;;  %s1760_s4 = inlined_call_operand.vmem [shape: f32[1,128], index: 4, kind: input, shape index: {}]   ;;  %s1761_s5 = inlined_call_operand.hbm [shape: bf16[128,128], index: 5, kind: input, shape index: {}]   ;;  %s1762_s6 = inlined_call_operand.vmem [shape: f32[1,128], index: 6, kind: input, shape index: {}]   ;;  %s1763_s7 = inlined_call_operand.hbm [shape: bf16[128,128], index: 7, kind: input, shape index: {}]   ;;  %s1764_s8 = inlined_call_operand.vmem [shape: f32[1,128], index: 8, kind: input, shape index: {}]   ;;  %s1765_s9 = inlined_call_operand.hbm [shape: f32[8,128], index: 9, kind: output, shape index: {}]  }
   0x1   :  { %15 = vsyncpa [#allocation6], 0 }
   0x2   :  { %16 = vsyncpa [#allocation9], 0 }
   0x3   :  { %17 = vsyncpa [#allocation4], 0  ;;  %s1614_s30 = smov [#allocation5]  }
   0x4   :  { %s33_s10 = sshll.u32 %s1614_s30, 4  ;;  %s34_s10 = int_to_ptr.vmem [resolvable:$true] %s33_s10 }
   0x5   :  { %s1494_s11 = scalar_lea.vmem %s34_s10, 7168  ;;  %p1499_p1 = scmp.lt.s32.totalorder %s34_s10, %s34_s10 }
   0x6   :  { %p1495_p0 = scmp.ne.s32.totalorder %s34_s10, %s1494_s11  ;;  %p1500_p2 = scmp.lt.s32.totalorder %s1494_s11, %s1494_s11 }
   0x8   :  { %p1501_p3 = por %p1500_p2, %p1499_p1 }
   0xa   :  { %p1502_p4 = pnand %p1501_p3, %p1495_p0 }
   0xc   :  { %1505 = shalt.err (!%p1502_p4)
}
   0xd   :  { %s1615_s12 = smov 64   ;;  %s1616_s13 = smov 4  }
   0xe   :  { %39 = dma.hbm_to_vmem [thread:$0]  %s1757_s1, 7168, %s34_s10, [#allocation6], %s1615_s12, %s1615_s12, %s1616_s13  }
   0xf   :  { %s1617_s16 = smov [#allocation8]   ;;  %s1618_s18 = smov [#allocation2]  }
  0x10   :  { %s61_s17 = sshll.u32 %s1617_s16, 4  ;;  %s24_s19 = sshll.u32 %s1618_s18, 4  ;;  %s62_s17 = int_to_ptr.vmem [resolvable:$true] %s61_s17  ;;  %s25_s19 = int_to_ptr.vmem [resolvable:$true] %s24_s19 }
  0x11   :  { %s1514_s20 = scalar_lea.vmem %s62_s17, 1024  ;;  %p1519_p6 = scmp.lt.s32.totalorder %s62_s17, %s62_s17 }
  0x12   :  { %p1515_p5 = scmp.ne.s32.totalorder %s62_s17, %s1514_s20  ;;  %p1520_p7 = scmp.lt.s32.totalorder %s1514_s20, %s1514_s20 }
  0x14   :  { %p1521_p8 = por %p1520_p7, %p1519_p6 }
  0x16   :  { %p1522_p9 = pnand %p1521_p8, %p1515_p5 }
  0x18   :  { %1525 = shalt.err (!%p1522_p9)
}
  0x19   :  { %67 = dma.hbm_to_vmem [thread:$0]  %s1761_s5, 1024, %s62_s17, [#allocation9], %s1615_s12, %s1615_s12, %s1616_s13  }
  0x1a   :  { %s1534_s1 = scalar_lea.vmem %s25_s19, 448  ;;  %p1539_p11 = scmp.lt.s32.totalorder %s25_s19, %s25_s19 }
  0x1b   :  { %p1535_p10 = scmp.ne.s32.totalorder %s25_s19, %s1534_s1  ;;  %p1540_p12 = scmp.lt.s32.totalorder %s1534_s1, %s1534_s1 }
  0x1d   :  { %p1541_p13 = por %p1540_p12, %p1539_p11 }
  0x1f   :  { %p1542_p0 = pnand %p1541_p13, %p1535_p10 }
  0x21   :  { %1545 = shalt.err (!%p1542_p0)
}
  0x22   :  { %27 = dma.hbm_to_vmem [thread:$0]  %s1756_s0, 448, %s25_s19, [#allocation3]  }
  0x23   :  { %s1619_s25 = smov [#allocation7]   ;;  %s1620_s27 = smov [#allocation10]  }
  0x24   :  { %s47_s26 = sshll.u32 %s1619_s25, 4  ;;  %s75_s28 = sshll.u32 %s1620_s27, 4  ;;  %s48_s26 = int_to_ptr.vmem [resolvable:$true] %s47_s26  ;;  %s76_s28 = int_to_ptr.vmem [resolvable:$true] %s75_s28 }
  0x25   :  { %s1554_s29 = scalar_lea.vmem %s48_s26, 1024  ;;  %p1559_p2 = scmp.lt.s32.totalorder %s48_s26, %s48_s26 }
  0x26   :  { %p1555_p1 = scmp.ne.s32.totalorder %s48_s26, %s1554_s29  ;;  %p1560_p3 = scmp.lt.s32.totalorder %s1554_s29, %s1554_s29 }
  0x28   :  { %p1561_p4 = por %p1560_p3, %p1559_p2 }
  0x2a   :  { %p1562_p5 = pnand %p1561_p4, %p1555_p1 }
  0x2c   :  { %1565 = shalt.err (!%p1562_p5)
}
  0x2d   :  { %53 = dma.hbm_to_vmem [thread:$0]  %s1759_s3, 1024, %s48_s26, [#allocation6], %s1615_s12, %s1615_s12, %s1616_s13  }
  0x2e   :  { %s1574_s0 = scalar_lea.vmem %s76_s28, 1024  ;;  %p1579_p7 = scmp.lt.s32.totalorder %s76_s28, %s76_s28 }
  0x2f   :  { %p1575_p6 = scmp.ne.s32.totalorder %s76_s28, %s1574_s0  ;;  %p1580_p8 = scmp.lt.s32.totalorder %s1574_s0, %s1574_s0 }
  0x31   :  { %p1581_p9 = por %p1580_p8, %p1579_p7 }
  0x33   :  { %p1582_p10 = pnand %p1581_p9, %p1575_p6 }
  0x35   :  { %1585 = shalt.err (!%p1582_p10)
}
  0x36   :  { %81 = dma.hbm_to_vmem [thread:$0]  %s1763_s7, 1024, %s76_s28, [#allocation9], %s1615_s12, %s1615_s12, %s1616_s13  }
  0x37   :  { %1606 = dma.done.wait [#allocation3], 448  }
  0x38   :  { %1607 = vsyncadd [#allocation3], 4294966848 }
  0x39   :  { %1608 = dma.done.wait [#allocation6], 8192  }
  0x3a   :  { %1609 = vsyncadd [#allocation6], 4294959104 }
  0x3b   :  { %1610 = dma.done.wait [#allocation9], 2048  }
  0x3c   :  { %1611 = vsyncadd [#allocation9], 4294965248  ;;  %v1395_v0 = vld [vmem:[#allocation5 + $0x78] sm:$0xff]   ;;  %v1399_v4 = vld [vmem:[#allocation5 + $0x70] sm:$0xff]   ;;  %v1621_v39 = vmov 0.0   ;;  %vm1622_vm0 = vmmov 0  }
  0x3d   :  { %v1396_v1 = vld [vmem:[#allocation5 + $0xf8] sm:$0xff]   ;;  %1203 = vmatprep.subr.bf16.mxu0 %v1395_v0  ;;  %v1400_v5 = vld [vmem:[#allocation5 + $0xf0] sm:$0xff]   ;;  %v1403_v8 = vld [vmem:[#allocation5 + $0x68] sm:$0xff]  }
  0x3e   :  { %v1397_v2 = vld [vmem:[#allocation5 + $0x38] sm:$0xff]   ;;  %1225 = vmatprep.subr.bf16.mxu1 %v1396_v1  ;;  %v1401_v6 = vld [vmem:[#allocation5 + $0x30] sm:$0xff]   ;;  %v1404_v9 = vld [vmem:[#allocation5 + $0xe8] sm:$0xff]  }
  0x3f   :  { %v1398_v3 = vld [vmem:[#allocation5 + $0xb8] sm:$0xff]   ;;  %1204 = vmatpush3.bf16.msra.mxu0 %v1397_v2  ;;  %v1402_v7 = vld [vmem:[#allocation5 + $0xb0] sm:$0xff]   ;;  %v1405_v10 = vld [vmem:[#allocation5 + $0x28] sm:$0xff]  }
  0x40   :  { %1226 = vmatpush3.bf16.msra.mxu1 %v1398_v3  ;;  %1205 = vmatprep.subr.bf16.mxu0 %v1399_v4  ;;  %v1406_v11 = vld [vmem:[#allocation5 + $0xa8] sm:$0xff]   ;;  %v1407_v12 = vld [vmem:[#allocation5 + $0x60] sm:$0xff]   ;;  %v1411_v16 = vld [vmem:[#allocation5 + $0x58] sm:$0xff]  }
  0x41   :  { %1227 = vmatprep.subr.bf16.mxu1 %v1400_v5  ;;  %v1408_v13 = vld [vmem:[#allocation5 + $0xe0] sm:$0xff]   ;;  %v1412_v17 = vld [vmem:[#allocation5 + $0xd8] sm:$0xff]   ;;  %v1415_v20 = vld [vmem:[#allocation5 + $0x50] sm:$0xff]  }
  0x42   :  { %v1409_v14 = vld [vmem:[#allocation5 + $0x20] sm:$0xff]   ;;  %v1413_v18 = vld [vmem:[#allocation5 + $0x18] sm:$0xff]   ;;  %v1416_v21 = vld [vmem:[#allocation5 + $0xd0] sm:$0xff]  }
  0x43   :  { %1206 = vmatpush3.bf16.msra.mxu0 %v1401_v6  ;;  %v1410_v15 = vld [vmem:[#allocation5 + $0xa0] sm:$0xff]   ;;  %v1414_v19 = vld [vmem:[#allocation5 + $0x98] sm:$0xff]   ;;  %v1417_v22 = vld [vmem:[#allocation5 + $0x10] sm:$0xff]  }
  0x44   :  { %1228 = vmatpush3.bf16.msra.mxu1 %v1402_v7  ;;  %1207 = vmatprep.subr.bf16.mxu0 %v1403_v8  ;;  %v1418_v23 = vld [vmem:[#allocation5 + $0x90] sm:$0xff]   ;;  %v1419_v24 = vld [vmem:[#allocation5 + $0x48] sm:$0xff]   ;;  %v1423_v28 = vld [vmem:[#allocation5 + $0x40] sm:$0xff]  }
  0x45   :  { %1229 = vmatprep.subr.bf16.mxu1 %v1404_v9  ;;  %v1420_v25 = vld [vmem:[#allocation5 + $0xc8] sm:$0xff]   ;;  %v1424_v29 = vld [vmem:[#allocation5 + $0xc0] sm:$0xff]   ;;  %v1431_v38 = vld [vmem:[#allocation5 + $0x178] sm:$0xff]  }
  0x46   :  { %v1421_v26 = vld [vmem:[#allocation5 + $0x8] sm:$0xff]   ;;  %v1425_v30 = vld [vmem:[#allocation5] sm:$0xff]   ;;  %v1432_v40 = vld [vmem:[#allocation5 + $0x138] sm:$0xff]  }
  0x47   :  { %1208 = vmatpush3.bf16.msra.mxu0 %v1405_v10  ;;  %v1422_v27 = vld [vmem:[#allocation5 + $0x88] sm:$0xff]   ;;  %v1426_v31 = vld [vmem:[#allocation5 + $0x80] sm:$0xff]   ;;  %v1433_v41 = vld [vmem:[#allocation5 + $0x1b8] sm:$0xff]  }
  0x48   :  { %1230 = vmatpush3.bf16.msra.mxu1 %v1406_v11  ;;  %1209 = vmatprep.subr.bf16.mxu0 %v1407_v12  ;;  %v100_v32 = vld [vmem:[#allocation2] sm:$0xff]  ;;  %v101_v33 = vld [vmem:[#allocation2 + $0x8] sm:$0xff]  ;;  %v1443_v51 = vld [vmem:[#allocation5 + $0x158] sm:$0xff]  }
  0x49   :  { %1231 = vmatprep.subr.bf16.mxu1 %v1408_v13  ;;  %v1113_v34 = vcombine.low %v100_v32, %v100_v32  ;;  %v1114_v35 = vcombine.high %v100_v32, %v100_v32  ;;  %v1115_v36 = vcombine.low %v101_v33, %v101_v33  ;;  %v1116_v37 = vcombine.high %v101_v33, %v101_v33  ;;  %v1434_v42 = vld [vmem:[#allocation5 + $0x170] sm:$0xff]   ;;  %v1437_v45 = vld [vmem:[#allocation5 + $0x168] sm:$0xff]   ;;  %v1440_v48 = vld [vmem:[#allocation5 + $0x160] sm:$0xff]  }
  0x4a   :  { %v1435_v43 = vld [vmem:[#allocation5 + $0x130] sm:$0xff]   ;;  %v1438_v46 = vld [vmem:[#allocation5 + $0x128] sm:$0xff]   ;;  %v1441_v49 = vld [vmem:[#allocation5 + $0x120] sm:$0xff]  }
  0x4b   :  { %1210 = vmatpush3.bf16.msra.mxu0 %v1409_v14  ;;  %616 = vmatprep.mubr.bf16.mxu0 %v1114_v35  ;;  %v1436_v44 = vld [vmem:[#allocation5 + $0x1b0] sm:$0xff]   ;;  %v1439_v47 = vld [vmem:[#allocation5 + $0x1a8] sm:$0xff]   ;;  %v1442_v50 = vld [vmem:[#allocation5 + $0x1a0] sm:$0xff]  }
  0x4c   :  { %1232 = vmatpush3.bf16.msra.mxu1 %v1410_v15  ;;  %1211 = vmatprep.subr.bf16.mxu0 %v1411_v16  ;;  %v1444_v52 = vld [vmem:[#allocation5 + $0x118] sm:$0xff]   ;;  %v1446_v54 = vld [vmem:[#allocation5 + $0x150] sm:$0xff]   ;;  %v1449_v57 = vld [vmem:[#allocation5 + $0x148] sm:$0xff]  }
  0x4d   :  { %1233 = vmatprep.subr.bf16.mxu1 %v1412_v17  ;;  %656 = vmatprep.mubr.bf16.mxu1 %v1116_v37  ;;  %v1445_v53 = vld [vmem:[#allocation5 + $0x198] sm:$0xff]   ;;  %v1447_v55 = vld [vmem:[#allocation5 + $0x110] sm:$0xff]   ;;  %v1450_v58 = vld [vmem:[#allocation5 + $0x108] sm:$0xff]  }
  0x4e   :  { %v1448_v56 = vld [vmem:[#allocation5 + $0x190] sm:$0xff]   ;;  %v1451_v59 = vld [vmem:[#allocation5 + $0x188] sm:$0xff]   ;;  %v1452_v61 = vld [vmem:[#allocation5 + $0x140] sm:$0xff]  }
  0x4f   :  { %1212 = vmatpush3.bf16.msra.mxu0 %v1413_v18  ;;  %v102_v60 = vld [vmem:[#allocation2 + $0x10] sm:$0xff]  ;;  %v1453_v63 = vld [vmem:[#allocation5 + $0x100] sm:$0xff]   ;;  %v1457_v1 = vld [vmem:[#allocation2 + $0x18] ss:$0 sps:$4 sm:$0xff]  }
  0x50   :  { %1234 = vmatpush3.bf16.msra.mxu1 %v1414_v19  ;;  %1213 = vmatprep.subr.bf16.mxu0 %v1415_v20  ;;  %v1118_v62 = vcombine.high %v102_v60, %v102_v60  ;;  %v1454_v0 = vld [vmem:[#allocation5 + $0x180] sm:$0xff]   ;;  %v1117_v2 = vcombine.low %v102_v60, %v102_v60  ;;  %v1458_v3 = vld [vmem:[#allocation7 + $0x38] sm:$0xff]   ;;  %v1459_v4 = vld [vmem:[#allocation7 + $0x30] sm:$0xff]  }
  0x51   :  { %1235 = vmatprep.subr.bf16.mxu1 %v1416_v21  ;;  %v1460_v5 = vld [vmem:[#allocation7 + $0x28] sm:$0xff]   ;;  %v1461_v6 = vld [vmem:[#allocation7 + $0x20] sm:$0xff]   ;;  %v1462_v7 = vld [vmem:[#allocation7 + $0x18] sm:$0xff]  }
  0x52   :  { %v1463_v8 = vld [vmem:[#allocation7 + $0x10] sm:$0xff]   ;;  %v1464_v9 = vld [vmem:[#allocation7 + $0x8] sm:$0xff]   ;;  %v1465_v10 = vld [vmem:[#allocation7] sm:$0xff]  }
  0x53   :  { %1214 = vmatpush3.bf16.msra.mxu0 %v1417_v22  ;;  %v1466_v11 = vld [vmem:[#allocation8 + $0x38] sm:$0xff]   ;;  %v1467_v12 = vld [vmem:[#allocation8 + $0x30] sm:$0xff]   ;;  %v1468_v13 = vld [vmem:[#allocation8 + $0x28] sm:$0xff]  }
  0x54   :  { %1236 = vmatpush3.bf16.msra.mxu1 %v1418_v23  ;;  %1215 = vmatprep.subr.bf16.mxu0 %v1419_v24  ;;  %v1469_v14 = vld [vmem:[#allocation8 + $0x20] sm:$0xff]   ;;  %v1470_v15 = vld [vmem:[#allocation8 + $0x18] sm:$0xff]   ;;  %v1471_v16 = vld [vmem:[#allocation8 + $0x10] sm:$0xff]  }
  0x55   :  { %1237 = vmatprep.subr.bf16.mxu1 %v1420_v25 }
  0x57   :  { %1216 = vmatpush3.bf16.msra.mxu0 %v1421_v26  ;;  %v1112_v26 = vld [vmem:[%s1758_s2] ss:$0 sm:$0xff] }
  0x58   :  { %1238 = vmatpush3.bf16.msra.mxu1 %v1422_v27  ;;  %1217 = vmatprep.subr.bf16.mxu0 %v1423_v28 }
  0x59   :  { %1239 = vmatprep.subr.bf16.mxu1 %v1424_v29 }
  0x5b   :  { %1218 = vmatpush3.bf16.msra.mxu0 %v1425_v30 }
  0x5c   :  { %1240 = vmatpush3.bf16.msra.mxu1 %v1426_v31  ;;  %1247 = vmatprep.subr.bf16.mxu0 %v1431_v38 }
  0x5d   :  { %1305 = vmatprep.subr.bf16.mxu1 %v1621_v39 }
  0x5e   :  { %617 = vmatmul.mubr.bf16.vlgmr.msra.gmra.mxu0 %v1113_v34 }
  0x5f   :  { %657 = vmatmul.mubr.bf16.vlgmr.msra.gmra.mxu1 %v1115_v36  ;;  %1248 = vmatpush3.bf16.msra.mxu0 %v1432_v40 }
  0x60   :  { %1306 = vmatpush3.bf16.msra.mxu1 %v1433_v41  ;;  %1249 = vmatprep.subr.bf16.mxu0 %v1434_v42 }
  0x61   :  { %1307 = vmatprep.subr.bf16.mxu1 %v1621_v39  ;;  %1321 = vmatprep.mubr.msk.bf16.mxu1 %vm1622_vm0, %v1621_v39 }
  0x62   :  { %696 = vmatprep.mubr.bf16.mxu0 %v1118_v62  ;;  %v1480_v62 = vld [vmem:[#allocation10 + $0x8] sm:$0xff]  }
  0x63   :  { %1250 = vmatpush3.bf16.msra.mxu0 %v1435_v43 }
  0x64   :  { %1308 = vmatpush3.bf16.msra.mxu1 %v1436_v44  ;;  %1251 = vmatprep.subr.bf16.mxu0 %v1437_v45  ;;  %v1472_v45 = vld [vmem:[#allocation8 + $0x8] sm:$0xff]  }
  0x65   :  { %1309 = vmatprep.subr.bf16.mxu1 %v1621_v39 }
  0x67   :  { %1252 = vmatpush3.bf16.msra.mxu0 %v1438_v46  ;;  %v1473_v46 = vld [vmem:[#allocation8] sm:$0xff]  }
  0x68   :  { %1310 = vmatpush3.bf16.msra.mxu1 %v1439_v47  ;;  %1253 = vmatprep.subr.bf16.mxu0 %v1440_v48  ;;  %v1474_v47 = vld [vmem:[#allocation10 + $0x38] sm:$0xff]   ;;  %v1475_v48 = vld [vmem:[#allocation10 + $0x30] sm:$0xff]  }
  0x69   :  { %1311 = vmatprep.subr.bf16.mxu1 %v1621_v39 }
  0x6b   :  { %1254 = vmatpush3.bf16.msra.mxu0 %v1441_v49  ;;  %v1476_v49 = vld [vmem:[#allocation10 + $0x28] sm:$0xff]  }
  0x6c   :  { %1312 = vmatpush3.bf16.msra.mxu1 %v1442_v50  ;;  %1255 = vmatprep.subr.bf16.mxu0 %v1443_v51  ;;  %v1477_v50 = vld [vmem:[#allocation10 + $0x20] sm:$0xff]   ;;  %v1478_v51 = vld [vmem:[#allocation10 + $0x18] sm:$0xff]  }
  0x6d   :  { %1313 = vmatprep.subr.bf16.mxu1 %v1621_v39 }
  0x6f   :  { %1256 = vmatpush3.bf16.msra.mxu0 %v1444_v52  ;;  %v1479_v52 = vld [vmem:[#allocation10 + $0x10] sm:$0xff]  }
  0x70   :  { %1314 = vmatpush3.bf16.msra.mxu1 %v1445_v53  ;;  %1257 = vmatprep.subr.bf16.mxu0 %v1446_v54  ;;  %v1176_v53 = vld [vmem:[%s1760_s4] ss:$0 sm:$0xff] }
  0x71   :  { %1315 = vmatprep.subr.bf16.mxu1 %v1621_v39 }
  0x73   :  { %1258 = vmatpush3.bf16.msra.mxu0 %v1447_v55 }
  0x74   :  { %1316 = vmatpush3.bf16.msra.mxu1 %v1448_v56  ;;  %1259 = vmatprep.subr.bf16.mxu0 %v1449_v57 }
  0x75   :  { %1317 = vmatprep.subr.bf16.mxu1 %v1621_v39 }
  0x77   :  { %1260 = vmatpush3.bf16.msra.mxu0 %v1450_v58 }
  0x78   :  { %1318 = vmatpush3.bf16.msra.mxu1 %v1451_v59  ;;  %1261 = vmatprep.subr.bf16.mxu0 %v1452_v61 }
  0x79   :  { %1319 = vmatprep.subr.bf16.mxu1 %v1621_v39 }
  0x7b   :  { %1262 = vmatpush3.bf16.msra.mxu0 %v1453_v63  ;;  %v1481_v63 = vld [vmem:[#allocation10] sm:$0xff]  }
  0x7c   :  { %1320 = vmatpush3.bf16.msra.mxu1 %v1454_v0  ;;  %1325 = vmatprep.subr.bf16.mxu0 %v1621_v39  ;;  %v1185_v0 = vld [vmem:[%s1762_s6] ss:$0 sm:$0xff]  ;;  %s1623_s6 = smov [#allocation11]  }
  0x7d   :  { %1345 = vmatprep.subr.bf16.mxu1 %v1621_v39  ;;  %s1101_s16 = sshll.u32 %s1623_s6, 4  ;;  %s1102_s16 = int_to_ptr.vmem [resolvable:$true] %s1101_s16 }
  0x7e   :  { %697 = vmatmul.mubr.bf16.vlgmr.msra.gmra.mxu0 %v1117_v2  ;;  %s1586_s17 = scalar_lea.vmem %s1102_s16, 128  ;;  %p1591_p12 = scmp.lt.s32.totalorder %s1102_s16, %s1102_s16 }
  0x7f   :  { %1322 = vmatmul.mubr.bf16.vlgmr.msra.gmra.mxu1 %v1457_v1  ;;  %1341 = vmatprep.mubr.msk.bf16.mxu0 %vm1622_vm0, %v1621_v39  ;;  %p1587_p11 = scmp.ne.s32.totalorder %s1102_s16, %s1586_s17  ;;  %p1592_p13 = scmp.lt.s32.totalorder %s1586_s17, %s1586_s17 }
  0x80   :  { %1361 = vmatprep.mubr.msk.bf16.mxu1 %vm1622_vm0, %v1621_v39  ;;  %1326 = vmatpush3.bf16.msra.mxu0 %v1458_v3 }
  0x81   :  { %1327 = vmatprep.subr.bf16.mxu0 %v1621_v39  ;;  %1346 = vmatpush3.bf16.msra.mxu1 %v1466_v11  ;;  %p1593_p0 = por %p1592_p13, %p1591_p12 }
  0x82   :  { %1347 = vmatprep.subr.bf16.mxu1 %v1621_v39 }
  0x83   :  { %p1594_p1 = pnand %p1593_p0, %p1587_p11 }
  0x84   :  { %1328 = vmatpush3.bf16.msra.mxu0 %v1459_v4 }
  0x85   :  { %1329 = vmatprep.subr.bf16.mxu0 %v1621_v39  ;;  %1348 = vmatpush3.bf16.msra.mxu1 %v1467_v12 }
  0x86   :  { %1349 = vmatprep.subr.bf16.mxu1 %v1621_v39 }
  0x88   :  { %1330 = vmatpush3.bf16.msra.mxu0 %v1460_v5 }
  0x89   :  { %1331 = vmatprep.subr.bf16.mxu0 %v1621_v39  ;;  %1350 = vmatpush3.bf16.msra.mxu1 %v1468_v13 }
  0x8a   :  { %1351 = vmatprep.subr.bf16.mxu1 %v1621_v39 }
  0x8c   :  { %1332 = vmatpush3.bf16.msra.mxu0 %v1461_v6 }
  0x8d   :  { %1333 = vmatprep.subr.bf16.mxu0 %v1621_v39  ;;  %1352 = vmatpush3.bf16.msra.mxu1 %v1469_v14 }
  0x8e   :  { %1353 = vmatprep.subr.bf16.mxu1 %v1621_v39 }
  0x90   :  { %1334 = vmatpush3.bf16.msra.mxu0 %v1462_v7 }
  0x91   :  { %1335 = vmatprep.subr.bf16.mxu0 %v1621_v39  ;;  %1354 = vmatpush3.bf16.msra.mxu1 %v1470_v15 }
  0x92   :  { %1355 = vmatprep.subr.bf16.mxu1 %v1621_v39 }
  0x94   :  { %1336 = vmatpush3.bf16.msra.mxu0 %v1463_v8 }
  0x95   :  { %1337 = vmatprep.subr.bf16.mxu0 %v1621_v39  ;;  %1356 = vmatpush3.bf16.msra.mxu1 %v1471_v16 }
  0x96   :  { %1357 = vmatprep.subr.bf16.mxu1 %v1621_v39 }
  0x98   :  { %1338 = vmatpush3.bf16.msra.mxu0 %v1464_v9 }
  0x99   :  { %1339 = vmatprep.subr.bf16.mxu0 %v1621_v39  ;;  %1358 = vmatpush3.bf16.msra.mxu1 %v1472_v45 }
  0x9a   :  { %1359 = vmatprep.subr.bf16.mxu1 %v1621_v39 }
  0x9c   :  { %1340 = vmatpush3.bf16.msra.mxu0 %v1465_v10 }
  0x9d   :  { %1365 = vmatprep.subr.bf16.mxu0 %v1621_v39  ;;  %1360 = vmatpush3.bf16.msra.mxu1 %v1473_v46 }
 0x11e   :  { %v1219_v17 = vpop.f32.mrf.mxu0 }
 0x11f   :  { %v1241_v18 = vpop.f32.mrf.mxu1 }
 0x120   :  { %v1220_v19 = vpop.f32.mrf.mxu0 }
 0x121   :  { %v1242_v20 = vpop.f32.mrf.mxu1  ;;  %v1221_v25 = vadd.f32 %v1220_v19, %v1219_v17 }
 0x122   :  { %v1222_v21 = vpop.f32.mrf.mxu0  ;;  %v1243_v28 = vadd.f32 %v1242_v20, %v1241_v18 }
 0x123   :  { %v1244_v22 = vpop.f32.mrf.mxu1  ;;  %v619_v27 = vadd.f32 %v1221_v25, %v1112_v26 }
 0x124   :  { %v1223_v23 = vpop.f32.mrf.mxu0 }
 0x125   :  { %v1245_v24 = vpop.f32.mrf.mxu1  ;;  %v659_v32 = vadd.f32 %v1243_v28, %v619_v27 }
 0x13e   :  { %v1263_v29 = vpop.f32.mrf.mxu0 }
 0x13f   :  { %v738_v30 = vpop.f32.mrf.mxu1 }
 0x140   :  { %v1264_v31 = vpop.f32.mrf.mxu0 }
 0x141   :  { %v1265_v33 = vadd.f32 %v1264_v31, %v1263_v29  ;;  %v1323_v34 = vpop.f32.mrf.mxu1 }
 0x142   :  { %v1266_v35 = vpop.f32.mrf.mxu0 }
 0x143   :  { %v699_v36 = vadd.f32 %v1265_v33, %v659_v32  ;;  %v741_v37 = vpop.f32.mrf.mxu1 }
 0x144   :  { %v1267_v38 = vpop.f32.mrf.mxu0 }
 0x145   :  { %v739_v40 = vadd.f32 %v738_v30, %v699_v36  ;;  %v1324_v41 = vpop.f32.mrf.mxu1 }
 0x147   :  { %vm744_vm1 = vcmp.gt.f32.partialorder %v739_v40, 0.0  ;;  %v745_v42 = vmul.f32 0.2, %v739_v40 }
 0x149   :  { %v746_v43 = vsel %vm744_vm1, %v739_v40, %v745_v42 }
 0x14a   :  { %v747_v44 = vpack.c.bf16 %v746_v43, %v746_v43 }
 0x14c   :  { %1342 = vmatmul.mubr.bf16.vlgmr.msra.gmra.mxu0 %v747_v44 }
 0x14d   :  { %1381 = vmatprep.mubr.msk.bf16.mxu0 %vm1622_vm0, %v1621_v39  ;;  %1366 = vmatpush3.bf16.msra.mxu0 %v1474_v47 }
 0x14e   :  { %1367 = vmatprep.subr.bf16.mxu0 %v1621_v39 }
 0x151   :  { %1368 = vmatpush3.bf16.msra.mxu0 %v1475_v48 }
 0x152   :  { %1369 = vmatprep.subr.bf16.mxu0 %v1621_v39 }
 0x155   :  { %1370 = vmatpush3.bf16.msra.mxu0 %v1476_v49 }
 0x156   :  { %1371 = vmatprep.subr.bf16.mxu0 %v1621_v39 }
 0x159   :  { %1372 = vmatpush3.bf16.msra.mxu0 %v1477_v50 }
 0x15a   :  { %1373 = vmatprep.subr.bf16.mxu0 %v1621_v39 }
 0x15d   :  { %1374 = vmatpush3.bf16.msra.mxu0 %v1478_v51 }
 0x15e   :  { %1375 = vmatprep.subr.bf16.mxu0 %v1621_v39 }
 0x161   :  { %1376 = vmatpush3.bf16.msra.mxu0 %v1479_v52 }
 0x162   :  { %1377 = vmatprep.subr.bf16.mxu0 %v1621_v39 }
 0x165   :  { %1378 = vmatpush3.bf16.msra.mxu0 %v1480_v62 }
 0x166   :  { %1379 = vmatprep.subr.bf16.mxu0 %v1621_v39  ;;  %v1194_v39 = vld [vmem:[%s1764_s8] ss:$0 sm:$0xff] }
 0x169   :  { %1380 = vmatpush3.bf16.msra.mxu0 %v1481_v63 }
 0x20c   :  { %v853_v54 = vpop.f32.mrf.mxu0 }
 0x20d   :  { %v854_v55 = vadd.f32 %v1176_v53, %v853_v54 }
 0x20e   :  { %v1343_v56 = vpop.f32.mrf.mxu0 }
 0x20f   :  { %vm859_vm2 = vcmp.gt.f32.partialorder %v854_v55, 0.0  ;;  %v860_v57 = vmul.f32 0.2, %v854_v55 }
 0x210   :  { %v856_v58 = vpop.f32.mrf.mxu0 }
 0x211   :  { %v861_v59 = vsel %vm859_vm2, %v854_v55, %v860_v57 }
 0x212   :  { %v862_v60 = vpack.c.bf16 %v861_v59, %v861_v59  ;;  %v1344_v61 = vpop.f32.mrf.mxu0 }
 0x214   :  { %1362 = vmatmul.mubr.bf16.vlgmr.msra.gmra.mxu1 %v862_v60 }
 0x2d4   :  { %v968_v1 = vpop.f32.mrf.mxu1 }
 0x2d5   :  { %v969_v2 = vadd.f32 %v1185_v0, %v968_v1 }
 0x2d6   :  { %v1363_v3 = vpop.f32.mrf.mxu1 }
 0x2d7   :  { %vm974_vm3 = vcmp.gt.f32.partialorder %v969_v2, 0.0  ;;  %v975_v4 = vmul.f32 0.2, %v969_v2 }
 0x2d8   :  { %v971_v5 = vpop.f32.mrf.mxu1 }
 0x2d9   :  { %v976_v6 = vsel %vm974_vm3, %v969_v2, %v975_v4 }
 0x2da   :  { %v977_v7 = vpack.c.bf16 %v976_v6, %v976_v6  ;;  %v1364_v8 = vpop.f32.mrf.mxu1 }
 0x2dc   :  { %1382 = vmatmul.mubr.bf16.vlgmr.msra.gmra.mxu0 %v977_v7 }
 0x39c   :  { %v1083_v9 = vpop.f32.mrf.mxu0 }
 0x39d   :  { %v1084_v10 = vadd.f32 %v1194_v39, %v1083_v9 }
 0x39e   :  { %v1383_v11 = vpop.f32.mrf.mxu0 }
 0x39f   :  { %v1089_v12 = vsub.f32 0.0, %v1084_v10 }
 0x3a0   :  { %v1086_v13 = vpop.f32.mrf.mxu0 }
 0x3a1   :  { %v1090_v14 = vmul.f32 1.442695, %v1089_v12 }
 0x3a2   :  { %v1384_v15 = vpop.f32.mrf.mxu0 }
 0x3a3   :  { %1482 = vpow2.f32 %v1090_v14 }
 0x3b0   :  { %v1483_v16 = vpop.eup %1482 }
 0x3b1   :  { %v1092_v17 = vadd.f32 1.0, %v1483_v16 }
 0x3b3   :  { %1484 = vrcp.f32 %v1092_v17 }
 0x3c0   :  { %v1485_v18 = vpop.eup %1484 }
 0x3c1   :  { %1094 = vst [vmem:[#allocation11] sm:$0xff] %v1485_v18 }
 0x3c2   :  { %1597 = shalt.err (!%p1594_p1)
}
 0x3c3   :  { %1104 = dma.vmem_to_hbm [thread:$0]  %s1102_s16, 128, %s1765_s9, [#allocation4]  }
 0x3c4   :  { %1612 = dma.done.wait [#allocation4], 128  }
 0x3c5   :  { %1613 = vsyncadd [#allocation4], 4294967168 }
 0x3c6   :  { %1108 = vsyncpa [#allocation3], 1 }
 0x3c7   :  { %1109 = vsyncpa [#allocation6], 1 }
 0x3c8   :  { %1110 = vsyncpa [#allocation9], 1 }
 0x3c9   :  { %1111 = vsyncpa [#allocation4], 1 }

</bundles_post_ra>
